<compile_context>
chip_gen: v7x
topology: tpu7x:2x2x1
jax: 0.10.0
libtpu: 0.0.40
codegen_flags: <defaults>
</compile_context>

<pallas_src>
import functools
import math

import jax
import jax.numpy as jnp
from jax.experimental import pallas as pl
from jax.experimental.pallas import tpu as pltpu

HIDDEN = 256
LOG_SCALE_MIN = -20.0
LOG_SCALE_MAX = 2.0
HALF_LOG_2PI = 0.5 * math.log(2.0 * math.pi)
LOG2 = math.log(2.0)


def _round_up(x, m):
    return ((x + m - 1) // m) * m


def _head_layout(ac_dim):
    """Pack both heads into one lane-aligned N block.

    mean lives in lanes [0:ac_dim], log_scale in lanes [scale_off:scale_off+ac_dim].
    For ac_dim <= 64 this fits a single 128-lane block (halves head N on v5e)."""
    scale_off = 64 if ac_dim <= 64 else _round_up(ac_dim, 128)
    head_n = _round_up(scale_off + ac_dim, 128)
    return scale_off, head_n


def _vmem_limit(tile_b, obs_dim, head_n, ac_dim):
    lane = lambda n: _round_up(max(int(n), 1), 128)
    weights = 2 * (obs_dim * HIDDEN + HIDDEN * HIDDEN + HIDDEN * head_n) \
        + 4 * (HIDDEN + HIDDEN + head_n)
    io = 2 * tile_b * (2 * lane(obs_dim) + 4 * lane(ac_dim) + 4 * lane(ac_dim + 1))
    interm = 4 * tile_b * (2 * HIDDEN + head_n + 12 * lane(ac_dim))
    est = 2 * weights + io + interm + (4 << 20)
    return int(min(56 << 20, max(32 << 20, est)))


def _sac_actor_kernel(ac_dim, scale_off,
                      scal_ref,            # SMEM (1,) f32: [ac_lim]
                      x_ref, eps_ref,      # (tile_b, obs_dim) bf16 / (tile_b, ac_dim) f32
                      w1_ref, b1_ref,
                      w2_ref, b2_ref,
                      wh_ref, bh_ref,      # packed heads: (256, head_n) / (1, head_n)
                      out_ref):            # (tile_b, ac_dim+1) f32: [action | logp]
    ac_lim = scal_ref[0]

    # fc1 + relu  (bf16 MXU inputs, f32 accumulation)
    h1 = jnp.dot(x_ref[...], w1_ref[...],
                 preferred_element_type=jnp.float32) + b1_ref[...]
    h1 = jnp.maximum(h1, 0.0)

    # fc2 + relu
    h2 = jnp.dot(h1.astype(jnp.bfloat16), w2_ref[...],
                 preferred_element_type=jnp.float32) + b2_ref[...]
    h2 = jnp.maximum(h2, 0.0)

    # packed heads: mean in lanes [0:ac_dim], log_scale in [scale_off:scale_off+ac_dim]
    head = jnp.dot(h2.astype(jnp.bfloat16), wh_ref[...],
                   preferred_element_type=jnp.float32) + bh_ref[...]
    mean = head[:, :ac_dim]
    log_scale = jnp.clip(head[:, scale_off:scale_off + ac_dim],
                         LOG_SCALE_MIN, LOG_SCALE_MAX)
    scale = jnp.exp(log_scale)

    # rsample; eps is the zero tile on the deterministic path, so a == mean there.
    # note z = (a - mean)/scale == eps by construction (no divide needed).
    e = eps_ref[...]
    a = mean + e * scale

    # stable softplus(-2a) = max(-2a, 0) + log1p(exp(-2|a|))
    q = jnp.exp(-2.0 * jnp.abs(a))
    softplus_m2a = jnp.maximum(-2.0 * a, 0.0) + jnp.log1p(q)

    # Normal log-prob + tanh squash correction (all lanes valid: ac_dim-wide arrays)
    logp_el = -log_scale - HALF_LOG_2PI - 0.5 * e * e
    corr_el = 2.0 * (LOG2 - a - softplus_m2a)
    logp = jnp.sum(logp_el - corr_el, axis=-1, keepdims=True)      # (tile_b, 1)

    action = jnp.tanh(a) * ac_lim

    # narrow lane-slice stores into the (tile_b, ac_dim+1) output block
    out_ref[:, :ac_dim] = action
    out_ref[:, ac_dim:ac_dim + 1] = logp


def sac_actor_forward(x, params, ac_lim, eps=None, deterministic=False, tile_b=1024):
    """SAC actor forward (continuous head) in a single batch-tiled Pallas kernel.

    x: (B, obs_dim) float32.  Returns (action (B, ac_dim), log_prob (B,))."""
    B, obs_dim = x.shape
    ac_dim = params["ac_dim"]
    scale_off = params["scale_off"]

    # batch tiling: 16-row alignment (bf16 sublane pack); if a single tile would
    # cover a big batch, split in two so the "parallel" axis can use both v7x TCs.
    tile_b = int(min(tile_b, B))
    if tile_b == B and B >= 64:
        tile_b = _round_up(pl.cdiv(B, 2), 16)
    if tile_b < B:
        tile_b = _round_up(tile_b, 16)
    Bp = tile_b * pl.cdiv(B, tile_b)

    xb = x.astype(jnp.bfloat16)
    if Bp != B:
        xb = jnp.pad(xb, ((0, Bp - B), (0, 0)))

    vmem = pltpu.MemorySpace.VMEM

    if deterministic or eps is None:
        # no per-row noise DMA: one zero tile, VMEM-resident across all grid steps
        eps_arr = jnp.zeros((tile_b, ac_dim), jnp.float32)
        eps_spec = pl.BlockSpec((tile_b, ac_dim), lambda i: (0, 0), memory_space=vmem)
    else:
        eps_arr = eps.astype(jnp.float32)
        if Bp != B:
            eps_arr = jnp.pad(eps_arr, ((0, Bp - B), (0, 0)))
        eps_spec = pl.BlockSpec((tile_b, ac_dim), lambda i: (i, 0), memory_space=vmem)

    scal = jnp.array([float(ac_lim)], jnp.float32)

    def resident(arr):  # whole-array, VMEM-resident across all grid steps
        return pl.BlockSpec(arr.shape, lambda i: (0, 0), memory_space=vmem)

    out = pl.pallas_call(
        functools.partial(_sac_actor_kernel, ac_dim, scale_off),
        out_shape=jax.ShapeDtypeStruct((Bp, ac_dim + 1), jnp.float32),
        grid=(Bp // tile_b,),
        in_specs=[
            pl.BlockSpec(memory_space=pltpu.MemorySpace.SMEM),          # ac_lim scalar
            pl.BlockSpec((tile_b, obs_dim), lambda i: (i, 0), memory_space=vmem),
            eps_spec,
            resident(params["w1"]), resident(params["b1"]),
            resident(params["w2"]), resident(params["b2"]),
            resident(params["wh"]), resident(params["bh"]),
        ],
        out_specs=pl.BlockSpec((tile_b, ac_dim + 1), lambda i: (i, 0),
                               memory_space=vmem),
        compiler_params=pltpu.CompilerParams(
            dimension_semantics=("parallel",),
            vmem_limit_bytes=_vmem_limit(tile_b, obs_dim, params["head_n"], ac_dim),
        ),
    )(scal, xb, eps_arr,
      params["w1"], params["b1"],
      params["w2"], params["b2"],
      params["wh"], params["bh"])

    action = out[:B, :ac_dim]
    logp = out[:B, ac_dim]
    return action, logp


def init_params(key, obs_dim, ac_dim):
    """PyTorch-layout init mimicking nn.Linear U(-1/sqrt(fan_in), 1/sqrt(fan_in))."""
    def linear(k, fan_in, fan_out):
        kw, kb = jax.random.split(k)
        bound = 1.0 / math.sqrt(fan_in)
        w = jax.random.uniform(kw, (fan_out, fan_in), jnp.float32, -bound, bound)
        b = jax.random.uniform(kb, (fan_out,), jnp.float32, -bound, bound)
        return w, b

    k1, k2, k3, k4 = jax.random.split(key, 4)
    w1, b1 = linear(k1, obs_dim, HIDDEN)
    w2, b2 = linear(k2, HIDDEN, HIDDEN)
    wp, bp = linear(k3, HIDDEN, ac_dim)     # fc_prob
    ws, bs = linear(k4, HIDDEN, ac_dim)     # fc_scale
    return dict(w1=w1, b1=b1, w2=w2, b2=b2, wp=wp, bp=bp, ws=ws, bs=bs)


def pack_params(p, obs_dim, ac_dim):
    """Transpose to (in, out), pack both heads into one lane block, cast weights bf16."""
    scale_off, head_n = _head_layout(ac_dim)

    w1 = p["w1"].T.astype(jnp.bfloat16)                       # (obs_dim, 256)
    w2 = p["w2"].T.astype(jnp.bfloat16)                       # (256, 256)
    b1 = p["b1"].reshape(1, HIDDEN).astype(jnp.float32)
    b2 = p["b2"].reshape(1, HIDDEN).astype(jnp.float32)

    wh = jnp.zeros((HIDDEN, head_n), jnp.float32)
    wh = wh.at[:, :ac_dim].set(p["wp"].T)
    wh = wh.at[:, scale_off:scale_off + ac_dim].set(p["ws"].T)
    wh = wh.astype(jnp.bfloat16)                               # (256, head_n)

    bh = jnp.zeros((1, head_n), jnp.float32)
    bh = bh.at[0, :ac_dim].set(p["bp"])
    bh = bh.at[0, scale_off:scale_off + ac_dim].set(p["bs"])

    return dict(w1=w1, b1=b1, w2=w2, b2=b2, wh=wh, bh=bh,
                ac_dim=int(ac_dim), scale_off=int(scale_off), head_n=int(head_n),
                obs_dim=int(obs_dim))


def _reference_forward(x, packed, ac_lim, eps):
    """Pure-JAX reference with the same bf16-input / f32-accumulate matmuls."""
    f32 = jnp.float32
    ac_dim, soff = packed["ac_dim"], packed["scale_off"]
    h1 = jax.nn.relu(jnp.dot(x.astype(jnp.bfloat16), packed["w1"],
                             preferred_element_type=f32) + packed["b1"])
    h2 = jax.nn.relu(jnp.dot(h1.astype(jnp.bfloat16), packed["w2"],
                             preferred_element_type=f32) + packed["b2"])
    head = jnp.dot(h2.astype(jnp.bfloat16), packed["wh"],
                   preferred_element_type=f32) + packed["bh"]
    mean = head[:, :ac_dim]
    log_scale = jnp.clip(head[:, soff:soff + ac_dim], LOG_SCALE_MIN, LOG_SCALE_MAX)
    scale = jnp.exp(log_scale)
    a = mean + eps * scale
    logp = jnp.sum(-log_scale - HALF_LOG_2PI - 0.5 * eps * eps, axis=-1)
    corr = 2.0 * jnp.sum(LOG2 - a - jax.nn.softplus(-2.0 * a), axis=-1)
    return jnp.tanh(a) * ac_lim, logp - corr


if __name__ == "__main__":
    key = jax.random.PRNGKey(0)
    k_params, k_x, k_eps, k_x2, k_eps2 = jax.random.split(key, 5)

    batch, obs_dim, ac_dim = 2, 16, 8
    ac_lim = 2.0

    params = pack_params(init_params(k_params, obs_dim, ac_dim), obs_dim, ac_dim)
    x = jax.random.normal(k_x, (batch, obs_dim), jnp.float32)
    eps = jax.random.normal(k_eps, (batch, ac_dim), jnp.float32)

    # stochastic path (rsample with external N(0,1) noise)
    action, logp = sac_actor_forward(x, params, ac_lim, eps=eps, deterministic=False)
    jax.block_until_ready((action, logp))

    # deterministic path (action = tanh(mean) * ac_lim, no noise DMA at all)
    action_det, logp_det = sac_actor_forward(x, params, ac_lim, deterministic=True)
    jax.block_until_ready((action_det, logp_det))

    ref_a, ref_lp = _reference_forward(x, params, ac_lim, eps)
    assert jnp.allclose(action, ref_a, atol=1e-2, rtol=1e-2)
    assert jnp.allclose(logp, ref_lp, atol=1e-2, rtol=1e-2)

    ref_a0, ref_lp0 = _reference_forward(x, params, ac_lim, jnp.zeros((batch, ac_dim)))
    assert jnp.allclose(action_det, ref_a0, atol=1e-2, rtol=1e-2)
    assert jnp.allclose(logp_det, ref_lp0, atol=1e-2, rtol=1e-2)

    # larger batch, default tile -> split into 2 grid steps (megacore) + row padding
    B2 = 300
    x2 = jax.random.normal(k_x2, (B2, obs_dim), jnp.float32)
    eps2 = jax.random.normal(k_eps2, (B2, ac_dim), jnp.float32)
    a2, lp2 = sac_actor_forward(x2, params, ac_lim, eps=eps2)
    jax.block_until_ready((a2, lp2))
    ref_a2, ref_lp2 = _reference_forward(x2, params, ac_lim, eps2)
    assert jnp.allclose(a2, ref_a2, atol=1e-2, rtol=1e-2)
    assert jnp.allclose(lp2, ref_lp2, atol=1e-2, rtol=1e-2)

    # explicit small tile -> 3-step grid path
    a3, lp3 = sac_actor_forward(x2, params, ac_lim, eps=eps2, tile_b=128)
    jax.block_until_ready((a3, lp3))
    assert jnp.allclose(a3, ref_a2, atol=1e-2, rtol=1e-2)
    assert jnp.allclose(lp3, ref_lp2, atol=1e-2, rtol=1e-2)

    print("KERNEL_OK")
</pallas_src>

<mosaic_0001>
module attributes {stable_mosaic.version = 11 : i64} {
  func.func @_sac_actor_kernel(%arg0: i32, %arg1: memref<1xf32, #tpu.memory_space<smem>>, %arg2: memref<2x16xbf16, #tpu.memory_space<vmem>>, %arg3: memref<2x8xf32, #tpu.memory_space<vmem>>, %arg4: memref<16x256xbf16, #tpu.memory_space<vmem>>, %arg5: memref<1x256xf32, #tpu.memory_space<vmem>>, %arg6: memref<256x256xbf16, #tpu.memory_space<vmem>>, %arg7: memref<1x256xf32, #tpu.memory_space<vmem>>, %arg8: memref<256x128xbf16, #tpu.memory_space<vmem>>, %arg9: memref<1x128xf32, #tpu.memory_space<vmem>>, %arg10: memref<2x9xf32, #tpu.memory_space<vmem>>) attributes {dimension_semantics = [#tpu.dimension_semantics<parallel>], iteration_bounds = array<i64: 1>, scalar_prefetch = 0 : i64, scratch_operands = 0 : i64, tpu.core_type = #tpu.core_type<tc>, window_params = [{transform_indices = @transform_0, window_bounds = array<i64: 1>}, {transform_indices = @transform_1, window_bounds = array<i64: 2, 16>}, {transform_indices = @transform_2, window_bounds = array<i64: 2, 8>}, {pipeline_mode = #tpu.pipeline_mode<synchronous>, transform_indices = @transform_3, window_bounds = array<i64: 16, 256>}, {pipeline_mode = #tpu.pipeline_mode<synchronous>, transform_indices = @transform_4, window_bounds = array<i64: 1, 256>}, {pipeline_mode = #tpu.pipeline_mode<synchronous>, transform_indices = @transform_5, window_bounds = array<i64: 256, 256>}, {pipeline_mode = #tpu.pipeline_mode<synchronous>, transform_indices = @transform_6, window_bounds = array<i64: 1, 256>}, {pipeline_mode = #tpu.pipeline_mode<synchronous>, transform_indices = @transform_7, window_bounds = array<i64: 256, 128>}, {pipeline_mode = #tpu.pipeline_mode<synchronous>, transform_indices = @transform_8, window_bounds = array<i64: 1, 128>}, {transform_indices = @transform_9, window_bounds = array<i64: 2, 9>}]} {
    %c0 = arith.constant 0 : index
    %0 = memref.load %arg1[%c0] : memref<1xf32, #tpu.memory_space<smem>>
    %c0_0 = arith.constant 0 : index
    %c0_1 = arith.constant 0 : index
    %1 = vector.load %arg2[%c0_0, %c0_1] : memref<2x16xbf16, #tpu.memory_space<vmem>>, vector<2x16xbf16>
    %c0_2 = arith.constant 0 : index
    %c0_3 = arith.constant 0 : index
    %2 = vector.load %arg4[%c0_2, %c0_3] : memref<16x256xbf16, #tpu.memory_space<vmem>>, vector<16x256xbf16>
    %cst = arith.constant dense<0.000000e+00> : vector<2x256xf32>
    %3 = tpu.matmul %1, %2, %cst {dimension_numbers = #tpu.dot_dimension_numbers<[1], [0], [0], [1], [0, 0, 1, 1], [], []>} : vector<2x16xbf16>, vector<16x256xbf16>, vector<2x256xf32> -> vector<2x256xf32>
    %c0_4 = arith.constant 0 : index
    %c0_5 = arith.constant 0 : index
    %4 = vector.load %arg5[%c0_4, %c0_5] : memref<1x256xf32, #tpu.memory_space<vmem>>, vector<1x256xf32>
    %5 = vector.broadcast %4 : vector<1x256xf32> to vector<2x256xf32>
    %6 = arith.addf %3, %5 : vector<2x256xf32>
    %cst_6 = arith.constant 0.000000e+00 : f32
    %7 = vector.broadcast %cst_6 : f32 to vector<2x256xf32>
    %8 = arith.maximumf %6, %7 : vector<2x256xf32>
    %9 = arith.truncf %8 : vector<2x256xf32> to vector<2x256xbf16>
    %c0_7 = arith.constant 0 : index
    %c0_8 = arith.constant 0 : index
    %10 = vector.load %arg6[%c0_7, %c0_8] : memref<256x256xbf16, #tpu.memory_space<vmem>>, vector<256x256xbf16>
    %cst_9 = arith.constant dense<0.000000e+00> : vector<2x256xf32>
    %11 = tpu.matmul %9, %10, %cst_9 {dimension_numbers = #tpu.dot_dimension_numbers<[1], [0], [0], [1], [0, 0, 1, 1], [], []>} : vector<2x256xbf16>, vector<256x256xbf16>, vector<2x256xf32> -> vector<2x256xf32>
    %c0_10 = arith.constant 0 : index
    %c0_11 = arith.constant 0 : index
    %12 = vector.load %arg7[%c0_10, %c0_11] : memref<1x256xf32, #tpu.memory_space<vmem>>, vector<1x256xf32>
    %13 = vector.broadcast %12 : vector<1x256xf32> to vector<2x256xf32>
    %14 = arith.addf %11, %13 : vector<2x256xf32>
    %cst_12 = arith.constant 0.000000e+00 : f32
    %15 = vector.broadcast %cst_12 : f32 to vector<2x256xf32>
    %16 = arith.maximumf %14, %15 : vector<2x256xf32>
    %17 = arith.truncf %16 : vector<2x256xf32> to vector<2x256xbf16>
    %c0_13 = arith.constant 0 : index
    %c0_14 = arith.constant 0 : index
    %18 = vector.load %arg8[%c0_13, %c0_14] : memref<256x128xbf16, #tpu.memory_space<vmem>>, vector<256x128xbf16>
    %cst_15 = arith.constant dense<0.000000e+00> : vector<2x128xf32>
    %19 = tpu.matmul %17, %18, %cst_15 {dimension_numbers = #tpu.dot_dimension_numbers<[1], [0], [0], [1], [0, 0, 1, 1], [], []>} : vector<2x256xbf16>, vector<256x128xbf16>, vector<2x128xf32> -> vector<2x128xf32>
    %c0_16 = arith.constant 0 : index
    %c0_17 = arith.constant 0 : index
    %20 = vector.load %arg9[%c0_16, %c0_17] : memref<1x128xf32, #tpu.memory_space<vmem>>, vector<1x128xf32>
    %21 = vector.broadcast %20 : vector<1x128xf32> to vector<2x128xf32>
    %22 = arith.addf %19, %21 : vector<2x128xf32>
    %23 = vector.extract_strided_slice %22 {offsets = [0, 0], sizes = [2, 8], strides = [1, 1]} : vector<2x128xf32> to vector<2x8xf32>
    %24 = vector.extract_strided_slice %22 {offsets = [0, 64], sizes = [2, 8], strides = [1, 1]} : vector<2x128xf32> to vector<2x8xf32>
    %cst_18 = arith.constant -2.000000e+01 : f32
    %cst_19 = arith.constant 2.000000e+00 : f32
    %25 = vector.broadcast %cst_18 : f32 to vector<2x8xf32>
    %26 = arith.maximumf %25, %24 : vector<2x8xf32>
    %27 = vector.broadcast %cst_19 : f32 to vector<2x8xf32>
    %28 = arith.minimumf %27, %26 : vector<2x8xf32>
    %29 = math.exp %28 : vector<2x8xf32>
    %c0_20 = arith.constant 0 : index
    %c0_21 = arith.constant 0 : index
    %30 = vector.load %arg3[%c0_20, %c0_21] : memref<2x8xf32, #tpu.memory_space<vmem>>, vector<2x8xf32>
    %31 = arith.mulf %30, %29 : vector<2x8xf32>
    %32 = arith.addf %23, %31 : vector<2x8xf32>
    %33 = math.absf %32 : vector<2x8xf32>
    %cst_22 = arith.constant -2.000000e+00 : f32
    %34 = vector.broadcast %cst_22 : f32 to vector<2x8xf32>
    %35 = arith.mulf %34, %33 : vector<2x8xf32>
    %36 = math.exp %35 : vector<2x8xf32>
    %cst_23 = arith.constant -2.000000e+00 : f32
    %37 = vector.broadcast %cst_23 : f32 to vector<2x8xf32>
    %38 = arith.mulf %37, %32 : vector<2x8xf32>
    %cst_24 = arith.constant 0.000000e+00 : f32
    %39 = vector.broadcast %cst_24 : f32 to vector<2x8xf32>
    %40 = arith.maximumf %38, %39 : vector<2x8xf32>
    %41 = math.log1p %36 : vector<2x8xf32>
    %42 = arith.addf %40, %41 : vector<2x8xf32>
    %cst_25 = arith.constant 0.000000e+00 : f32
    %43 = vector.broadcast %cst_25 : f32 to vector<2x8xf32>
    %44 = arith.subf %43, %28 : vector<2x8xf32>
    %cst_26 = arith.constant 0.918938517 : f32
    %45 = vector.broadcast %cst_26 : f32 to vector<2x8xf32>
    %46 = arith.subf %44, %45 : vector<2x8xf32>
    %cst_27 = arith.constant 5.000000e-01 : f32
    %47 = vector.broadcast %cst_27 : f32 to vector<2x8xf32>
    %48 = arith.mulf %47, %30 : vector<2x8xf32>
    %49 = arith.mulf %48, %30 : vector<2x8xf32>
    %50 = arith.subf %46, %49 : vector<2x8xf32>
    %cst_28 = arith.constant 0.693147182 : f32
    %51 = vector.broadcast %cst_28 : f32 to vector<2x8xf32>
    %52 = arith.subf %51, %32 : vector<2x8xf32>
    %53 = arith.subf %52, %42 : vector<2x8xf32>
    %cst_29 = arith.constant 2.000000e+00 : f32
    %54 = vector.broadcast %cst_29 : f32 to vector<2x8xf32>
    %55 = arith.mulf %54, %53 : vector<2x8xf32>
    %56 = arith.subf %50, %55 : vector<2x8xf32>
    %cst_30 = arith.constant dense<0.000000e+00> : vector<2xf32>
    %57 = vector.multi_reduction <add>, %56, %cst_30 [1] : vector<2x8xf32> to vector<2xf32>
    %58 = vector.shape_cast %57 : vector<2xf32> to vector<2x1xf32>
    %59 = math.tanh %32 : vector<2x8xf32>
    %60 = vector.broadcast %0 : f32 to vector<2x8xf32>
    %61 = arith.mulf %59, %60 : vector<2x8xf32>
    %c0_31 = arith.constant 0 : index
    %c0_32 = arith.constant 0 : index
    %62 = vector.load %arg10[%c0_31, %c0_32] : memref<2x9xf32, #tpu.memory_space<vmem>>, vector<2x8xf32>
    tpu.vector_store %arg10[%c0_31, %c0_32], %61 {strides = array<i32>} : memref<2x9xf32, #tpu.memory_space<vmem>>, vector<2x8xf32>,
    %c0_33 = arith.constant 0 : index
    %c8 = arith.constant 8 : index
    %63 = vector.load %arg10[%c0_33, %c8] : memref<2x9xf32, #tpu.memory_space<vmem>>, vector<2x1xf32>
    tpu.vector_store %arg10[%c0_33, %c8], %58 {strides = array<i32>} : memref<2x9xf32, #tpu.memory_space<vmem>>, vector<2x1xf32>,
    return
  }
  func.func @transform_0(%arg0: i32) -> i32 {
    %c0_i32 = arith.constant 0 : i32
    %c0_i32_0 = arith.constant 0 : i32
    return %c0_i32 : i32
  }
  func.func @transform_1(%arg0: i32) -> (i32, i32) {
    %c0_i32 = arith.constant 0 : i32
    %c0_i32_0 = arith.constant 0 : i32
    return %arg0, %c0_i32 : i32, i32
  }
  func.func @transform_2(%arg0: i32) -> (i32, i32) {
    %c0_i32 = arith.constant 0 : i32
    %c0_i32_0 = arith.constant 0 : i32
    return %arg0, %c0_i32 : i32, i32
  }
  func.func @transform_3(%arg0: i32) -> (i32, i32) {
    %c0_i32 = arith.constant 0 : i32
    %c0_i32_0 = arith.constant 0 : i32
    %c0_i32_1 = arith.constant 0 : i32
    return %c0_i32, %c0_i32_0 : i32, i32
  }
  func.func @transform_4(%arg0: i32) -> (i32, i32) {
    %c0_i32 = arith.constant 0 : i32
    %c0_i32_0 = arith.constant 0 : i32
    %c0_i32_1 = arith.constant 0 : i32
    return %c0_i32, %c0_i32_0 : i32, i32
  }
  func.func @transform_5(%arg0: i32) -> (i32, i32) {
    %c0_i32 = arith.constant 0 : i32
    %c0_i32_0 = arith.constant 0 : i32
    %c0_i32_1 = arith.constant 0 : i32
    return %c0_i32, %c0_i32_0 : i32, i32
  }
  func.func @transform_6(%arg0: i32) -> (i32, i32) {
    %c0_i32 = arith.constant 0 : i32
    %c0_i32_0 = arith.constant 0 : i32
    %c0_i32_1 = arith.constant 0 : i32
    return %c0_i32, %c0_i32_0 : i32, i32
  }
  func.func @transform_7(%arg0: i32) -> (i32, i32) {
    %c0_i32 = arith.constant 0 : i32
    %c0_i32_0 = arith.constant 0 : i32
    %c0_i32_1 = arith.constant 0 : i32
    return %c0_i32, %c0_i32_0 : i32, i32
  }
  func.func @transform_8(%arg0: i32) -> (i32, i32) {
    %c0_i32 = arith.constant 0 : i32
    %c0_i32_0 = arith.constant 0 : i32
    %c0_i32_1 = arith.constant 0 : i32
    return %c0_i32, %c0_i32_0 : i32, i32
  }
  func.func @transform_9(%arg0: i32) -> (i32, i32) {
    %c0_i32 = arith.constant 0 : i32
    %c0_i32_0 = arith.constant 0 : i32
    return %arg0, %c0_i32 : i32, i32
  }
}

</mosaic_0001>

<bundles_post_ra>
// kernel: tpu_custom_call.1
= control target key start
LH: loop header
LB: loop body
LE: loop exit
PB: predicated region body
PF: predicated region fallthrough
CT: control target
= control target key end

     0   :  { %15 = vsyncpa [#allocation4], 0  ;;  %s1042_s0 = inlined_call_operand.<no memory space> [shape: f32[1], index: 0, kind: input, shape index: {}]   ;;  %s1043_s1 = inlined_call_operand.vmem [shape: bf16[2,16], index: 1, kind: input, shape index: {}]   ;;  %s1044_s2 = inlined_call_operand.vmem [shape: f32[2,8], index: 2, kind: input, shape index: {}]   ;;  %s1045_s3 = inlined_call_operand.hbm [shape: bf16[16,256], index: 3, kind: input, shape index: {}]   ;;  %s1046_s4 = inlined_call_operand.vmem [shape: f32[1,256], index: 4, kind: input, shape index: {}]   ;;  %s1047_s5 = inlined_call_operand.hbm [shape: bf16[256,256], index: 5, kind: input, shape index: {}]   ;;  %s1048_s6 = inlined_call_operand.vmem [shape: f32[1,256], index: 6, kind: input, shape index: {}]   ;;  %s1049_s7 = inlined_call_operand.hbm [shape: bf16[256,128], index: 7, kind: input, shape index: {}]   ;;  %s1050_s8 = inlined_call_operand.vmem [shape: f32[1,128], index: 8, kind: input, shape index: {}]   ;;  %s1051_s9 = inlined_call_operand.hbm [shape: f32[2,9], index: 9, kind: output, shape index: {}]  }
   0x1   :  { %16 = vsyncpa [#allocation7], 0 }
   0x2   :  { %17 = vsyncpa [#allocation5], 0  ;;  %s902_s30 = smov [#allocation6]   ;;  %s903_s11 = smov [#allocation3]  }
   0x3   :  { %s43_s10 = sshll.u32 %s902_s30, 4  ;;  %s29_s12 = sshll.u32 %s903_s11, 4  ;;  %s44_s10 = int_to_ptr.vmem [resolvable:$true] %s43_s10  ;;  %s961_s12 = int_to_ptr.vmem [resolvable:$true] %s29_s12 }
   0x4   :  { %s808_s15 = scalar_lea.hbm %s1047_s5, 4096 }
   0x5   :  { %p809_p0 = scmp.ne.s32.totalorder %s1047_s5, %s808_s15  ;;  %p812_p1 = scmp.lt.u32.totalorder %s808_s15, %s1047_s5 }
   0x7   :  { %p814_p2 = pnand %p812_p1, %p809_p0 }
   0x9   :  { %817 = shalt.err (!%p814_p2)
}
   0xa   :  { %s818_s20 = scalar_lea.vmem %s44_s10, 4096  ;;  %p823_p4 = scmp.lt.s32.totalorder %s44_s10, %s44_s10 }
   0xb   :  { %p819_p3 = scmp.ne.s32.totalorder %s44_s10, %s818_s20  ;;  %p824_p5 = scmp.lt.s32.totalorder %s818_s20, %s818_s20 }
   0xd   :  { %p825_p6 = por %p824_p5, %p823_p4 }
   0xf   :  { %p826_p7 = pnand %p825_p6, %p819_p3 }
  0x11   :  { %829 = shalt.err (!%p826_p7)
}
  0x12   :  { %s904_s21 = smov 128   ;;  %s905_s22 = smov 8  }
  0x13   :  { %49 = dma.hbm_to_vmem [thread:$0]  %s1047_s5, 4096, %s44_s10, [#allocation7], %s904_s21, %s904_s21, %s905_s22  }
  0x14   :  { %s830_s27 = scalar_lea.hbm %s1045_s3, 256 }
  0x15   :  { %p831_p8 = scmp.ne.s32.totalorder %s1045_s3, %s830_s27  ;;  %p834_p9 = scmp.lt.u32.totalorder %s830_s27, %s1045_s3 }
  0x17   :  { %p836_p10 = pnand %p834_p9, %p831_p8 }
  0x19   :  { %839 = shalt.err (!%p836_p10)
}
  0x1a   :  { %s840_s13 = scalar_lea.vmem %s961_s12, 256  ;;  %p845_p12 = scmp.lt.s32.totalorder %s961_s12, %s961_s12 }
  0x1b   :  { %p841_p11 = scmp.ne.s32.totalorder %s961_s12, %s840_s13  ;;  %p846_p13 = scmp.lt.s32.totalorder %s840_s13, %s840_s13 }
  0x1d   :  { %p847_p0 = por %p846_p13, %p845_p12 }
  0x1f   :  { %p848_p1 = pnand %p847_p0, %p841_p11 }
  0x21   :  { %851 = shalt.err (!%p848_p1)
}
  0x22   :  { %35 = dma.hbm_to_vmem [thread:$0]  %s1045_s3, 256, %s961_s12, [#allocation4], %s904_s21, %s904_s21, %s905_s22  }
  0x23   :  { %s906_s14 = smov [#allocation8]   ;;  %s852_s18 = scalar_lea.hbm %s1049_s7, 2048 }
  0x24   :  { %s57_s15 = sshll.u32 %s906_s14, 4  ;;  %p853_p2 = scmp.ne.s32.totalorder %s1049_s7, %s852_s18  ;;  %s58_s15 = int_to_ptr.vmem [resolvable:$true] %s57_s15 }
  0x25   :  { %p856_p3 = scmp.lt.u32.totalorder %s852_s18, %s1049_s7 }
  0x27   :  { %p858_p4 = pnand %p856_p3, %p853_p2 }
  0x29   :  { %861 = shalt.err (!%p858_p4)
}
  0x2a   :  { %s862_s25 = scalar_lea.vmem %s58_s15, 2048  ;;  %p867_p6 = scmp.lt.s32.totalorder %s58_s15, %s58_s15 }
  0x2b   :  { %p863_p5 = scmp.ne.s32.totalorder %s58_s15, %s862_s25  ;;  %p868_p7 = scmp.lt.s32.totalorder %s862_s25, %s862_s25 }
  0x2d   :  { %p869_p8 = por %p868_p7, %p867_p6 }
  0x2f   :  { %p870_p9 = pnand %p869_p8, %p863_p5 }
  0x31   :  { %873 = shalt.err (!%p870_p9)
}
  0x32   :  { %s907_s3 = smov 64   ;;  %s908_s12 = smov 4  }
  0x33   :  { %63 = dma.hbm_to_vmem [thread:$0]  %s1049_s7, 2048, %s58_s15, [#allocation7], %s907_s3, %s907_s3, %s908_s12  }
  0x34   :  { %896 = dma.done.wait [#allocation4], 256  }
  0x35   :  { %897 = vsyncadd [#allocation4], 4294967040 }
  0x36   :  { %898 = dma.done.wait [#allocation7], 6144  }
  0x37   :  { %899 = vsyncadd [#allocation7], 4294961152  ;;  %v909_v0 = vmov 0   ;;  %v733_v1 = vld [vmem:[#allocation3 + $0x4] ss:$8 sps:$4 sm:$0xff]   ;;  %vm102_vm0 = vcmask 130048   ;;  %v82_v48 = vlaneseq }
  0x38   :  { %138 = vmatprep.mubr.bf16.mxu0 %v909_v0  ;;  %v735_v2 = vld [vmem:[#allocation3] ss:$8 sps:$4 sm:$0xff]   ;;  %106 = vmatprep.subr.bf16.mxu0 %v733_v1  ;;  %v736_v4 = vld [vmem:[#allocation6 + $0x4] ss:$8 sps:$4 sm:$0xff]   ;;  %v738_v5 = vld [vmem:[#allocation6] ss:$8 sps:$4 sm:$0xff]  }
  0x39   :  { %v77_v3 = vld [vmem:[%s1043_s1] sm:$0x1]  ;;  %107 = vmatpush1.bf16.msra.mxu0 %v735_v2  ;;  %v739_v6 = vld [vmem:[#allocation6 + $0x14] ss:$8 sps:$4 sm:$0xff]   ;;  %355 = vmatprep.subr.bf16.mxu1 %v736_v4  ;;  %v742_v8 = vld [vmem:[#allocation6 + $0x24] ss:$8 sps:$4 sm:$0xff]  }
  0x3a   :  { %356 = vmatpush1.bf16.msra.mxu1 %v738_v5  ;;  %v741_v7 = vld [vmem:[#allocation6 + $0x10] ss:$8 sps:$4 sm:$0xff]   ;;  %v744_v9 = vld [vmem:[#allocation6 + $0x20] ss:$8 sps:$4 sm:$0xff]   ;;  %v745_v10 = vld [vmem:[#allocation6 + $0x34] ss:$8 sps:$4 sm:$0xff]  }
  0x3b   :  { %357 = vmatprep.subr.bf16.mxu1 %v739_v6  ;;  %v747_v11 = vld [vmem:[#allocation6 + $0x30] ss:$8 sps:$4 sm:$0xff]   ;;  %v748_v12 = vld [vmem:[#allocation6 + $0x44] ss:$8 sps:$4 sm:$0xff]   ;;  %v750_v13 = vld [vmem:[#allocation6 + $0x40] ss:$8 sps:$4 sm:$0xff]  }
  0x3c   :  { %651 = vmatmul.mubr.msk.bf16.vlgmr.msra.gmra.mrb[0].mxu0 %vm102_vm0, %v77_v3  ;;  %v751_v14 = vld [vmem:[#allocation6 + $0x54] ss:$8 sps:$4 sm:$0xff]   ;;  %v753_v15 = vld [vmem:[#allocation6 + $0x50] ss:$8 sps:$4 sm:$0xff]   ;;  %v754_v16 = vld [vmem:[#allocation6 + $0x64] ss:$8 sps:$4 sm:$0xff]  }
  0x3d   :  { %v756_v17 = vld [vmem:[#allocation6 + $0x60] ss:$8 sps:$4 sm:$0xff]   ;;  %v757_v18 = vld [vmem:[#allocation6 + $0x74] ss:$8 sps:$4 sm:$0xff]   ;;  %v759_v19 = vld [vmem:[#allocation6 + $0x70] ss:$8 sps:$4 sm:$0xff]  }
  0x3e   :  { %358 = vmatpush1.bf16.msra.mxu1 %v741_v7  ;;  %v760_v20 = vld [vmem:[#allocation6 + $0x84] ss:$8 sps:$4 sm:$0xff]   ;;  %v762_v21 = vld [vmem:[#allocation6 + $0x80] ss:$8 sps:$4 sm:$0xff]   ;;  %v763_v22 = vld [vmem:[#allocation6 + $0x94] ss:$8 sps:$4 sm:$0xff]  }
  0x3f   :  { %359 = vmatprep.subr.bf16.mxu1 %v742_v8  ;;  %v765_v23 = vld [vmem:[#allocation6 + $0x90] ss:$8 sps:$4 sm:$0xff]   ;;  %v766_v24 = vld [vmem:[#allocation6 + $0xa4] ss:$8 sps:$4 sm:$0xff]   ;;  %v768_v25 = vld [vmem:[#allocation6 + $0xa0] ss:$8 sps:$4 sm:$0xff]  }
  0x40   :  { %v769_v26 = vld [vmem:[#allocation6 + $0xb4] ss:$8 sps:$4 sm:$0xff]   ;;  %v771_v27 = vld [vmem:[#allocation6 + $0xb0] ss:$8 sps:$4 sm:$0xff]   ;;  %v772_v28 = vld [vmem:[#allocation6 + $0xc4] ss:$8 sps:$4 sm:$0xff]  }
  0x41   :  { %v774_v29 = vld [vmem:[#allocation6 + $0xc0] ss:$8 sps:$4 sm:$0xff]   ;;  %v775_v30 = vld [vmem:[#allocation6 + $0xd4] ss:$8 sps:$4 sm:$0xff]   ;;  %v777_v31 = vld [vmem:[#allocation6 + $0xd0] ss:$8 sps:$4 sm:$0xff]  }
  0x42   :  { %360 = vmatpush1.bf16.msra.mxu1 %v744_v9  ;;  %v778_v32 = vld [vmem:[#allocation6 + $0xe4] ss:$8 sps:$4 sm:$0xff]   ;;  %v780_v33 = vld [vmem:[#allocation6 + $0xe0] ss:$8 sps:$4 sm:$0xff]   ;;  %v781_v34 = vld [vmem:[#allocation6 + $0xf4] ss:$8 sps:$4 sm:$0xff]  }
  0x43   :  { %361 = vmatprep.subr.bf16.mxu1 %v745_v10  ;;  %v783_v35 = vld [vmem:[#allocation6 + $0xf0] ss:$8 sps:$4 sm:$0xff]   ;;  %v784_v36 = vld [vmem:[#allocation8 + $0x40] sm:$0xff]   ;;  %v786_v38 = vld [vmem:[#allocation8 + $0x48] sm:$0xff]   ;;  %v83_v49 = vshrl.u32 %v82_v48, 7  ;;  %vm623_vm1 = vcmask 58368  }
  0x44   :  { %v785_v37 = vld [vmem:[#allocation8] sm:$0xff]   ;;  %702 = vmatprep.subr.bf16.mxu0 %v784_v36  ;;  %v787_v39 = vld [vmem:[#allocation8 + $0x8] sm:$0xff]   ;;  %v788_v40 = vld [vmem:[#allocation8 + $0x50] sm:$0xff]   ;;  %vm631_vm3 = vcmask 66624  }
  0x45   :  { %703 = vmatpush3.bf16.msra.mxu0 %v785_v37  ;;  %v789_v41 = vld [vmem:[#allocation8 + $0x10] sm:$0xff]   ;;  %v790_v42 = vld [vmem:[#allocation8 + $0x58] sm:$0xff]   ;;  %v792_v44 = vld [vmem:[#allocation8 + $0x60] sm:$0xff]   ;;  %v84_v50 = vsub.s32 0, %v83_v49  ;;  %v88_v52 = vsub.s32 1, %v83_v49 }
  0x46   :  { %362 = vmatpush1.bf16.msra.mxu1 %v747_v11  ;;  %704 = vmatprep.subr.bf16.mxu0 %v786_v38  ;;  %v791_v43 = vld [vmem:[#allocation8 + $0x18] sm:$0xff]   ;;  %v793_v45 = vld [vmem:[#allocation8 + $0x20] sm:$0xff]   ;;  %v794_v46 = vld [vmem:[#allocation8 + $0x68] sm:$0xff]   ;;  %v628_v38 = vstv %s1042_s0  ;;  %s910_s0 = smov [#allocation9]  }
  0x47   :  { %363 = vmatprep.subr.bf16.mxu1 %v748_v12  ;;  %v795_v47 = vld [vmem:[#allocation8 + $0x28] sm:$0xff]   ;;  %v80_v51 = vld [vmem:[%s1046_s4] sm:$0x3]  ;;  %v798_v3 = vld [vmem:[#allocation8 + $0x78] sm:$0xff]  }
  0x48   :  { %v85_v53 = vrot.slane %v80_v51, %v84_v50  ;;  %v89_v54 = vrot.slane %v80_v51, %v88_v52  ;;  %v796_v1 = vld [vmem:[#allocation8 + $0x70] sm:$0xff]   ;;  %v799_v4 = vld [vmem:[#allocation8 + $0x38] sm:$0xff]  }
  0x49   :  { %705 = vmatpush3.bf16.msra.mxu0 %v787_v39  ;;  %v797_v2 = vld [vmem:[#allocation8 + $0x30] sm:$0xff]  }
  0x4a   :  { %364 = vmatpush1.bf16.msra.mxu1 %v750_v13  ;;  %706 = vmatprep.subr.bf16.mxu0 %v788_v40  ;;  %v183_v5 = vld [vmem:[%s1048_s6] sm:$0x3] }
  0x4b   :  { %365 = vmatprep.subr.bf16.mxu1 %v751_v14  ;;  %v188_v6 = vrot.slane %v183_v5, %v84_v50  ;;  %v192_v7 = vrot.slane %v183_v5, %v88_v52 }
  0x4d   :  { %707 = vmatpush3.bf16.msra.mxu0 %v789_v41 }
  0x4e   :  { %366 = vmatpush1.bf16.msra.mxu1 %v753_v15  ;;  %708 = vmatprep.subr.bf16.mxu0 %v790_v42 }
  0x4f   :  { %367 = vmatprep.subr.bf16.mxu1 %v754_v16 }
  0x51   :  { %709 = vmatpush3.bf16.msra.mxu0 %v791_v43 }
  0x52   :  { %368 = vmatpush1.bf16.msra.mxu1 %v756_v17  ;;  %710 = vmatprep.subr.bf16.mxu0 %v792_v44 }
  0x53   :  { %369 = vmatprep.subr.bf16.mxu1 %v757_v18 }
  0x55   :  { %711 = vmatpush3.bf16.msra.mxu0 %v793_v45 }
  0x56   :  { %370 = vmatpush1.bf16.msra.mxu1 %v759_v19  ;;  %712 = vmatprep.subr.bf16.mxu0 %v794_v46  ;;  %v684_v19 = vld [vmem:[%s1050_s8] ss:$0 sm:$0xff] }
  0x57   :  { %371 = vmatprep.subr.bf16.mxu1 %v760_v20 }
  0x59   :  { %713 = vmatpush3.bf16.msra.mxu0 %v795_v47 }
  0x5a   :  { %372 = vmatpush1.bf16.msra.mxu1 %v762_v21  ;;  %714 = vmatprep.subr.bf16.mxu0 %v796_v1 }
  0x5b   :  { %373 = vmatprep.subr.bf16.mxu1 %v763_v22 }
  0x5d   :  { %715 = vmatpush3.bf16.msra.mxu0 %v797_v2 }
  0x5e   :  { %374 = vmatpush1.bf16.msra.mxu1 %v765_v23  ;;  %716 = vmatprep.subr.bf16.mxu0 %v798_v3 }
  0x5f   :  { %375 = vmatprep.subr.bf16.mxu1 %v766_v24 }
  0x61   :  { %717 = vmatpush3.bf16.msra.mxu0 %v799_v4 }
  0x62   :  { %376 = vmatpush1.bf16.msra.mxu1 %v768_v25 }
  0x63   :  { %377 = vmatprep.subr.bf16.mxu1 %v769_v26 }
  0x66   :  { %378 = vmatpush1.bf16.msra.mxu1 %v771_v27 }
  0x67   :  { %379 = vmatprep.subr.bf16.mxu1 %v772_v28  ;;  %v579_v28 = vld [vmem:[%s1044_s2] sm:$0x3]  ;;  %s639_s2 = sshll.u32 %s910_s0, 4  ;;  %s640_s2 = int_to_ptr.vmem [resolvable:$true] %s639_s2 }
  0x68   :  { %s874_s5 = scalar_lea.vmem %s640_s2, 32  ;;  %p879_p11 = scmp.lt.s32.totalorder %s640_s2, %s640_s2 }
  0x69   :  { %p875_p10 = scmp.ne.s32.totalorder %s640_s2, %s874_s5  ;;  %p880_p12 = scmp.lt.s32.totalorder %s874_s5, %s874_s5 }
  0x6a   :  { %380 = vmatpush1.bf16.msra.mxu1 %v774_v29  ;;  %v604_v29 = vmul.f32 0.5, %v579_v28 }
  0x6b   :  { %381 = vmatprep.subr.bf16.mxu1 %v775_v30  ;;  %p881_p13 = por %p880_p12, %p879_p11 }
  0x6d   :  { %p882_p0 = pnand %p881_p13, %p875_p10 }
  0x6e   :  { %382 = vmatpush1.bf16.msra.mxu1 %v777_v31  ;;  %v605_v31 = vmul.f32 %v604_v29, %v579_v28 }
  0x6f   :  { %383 = vmatprep.subr.bf16.mxu1 %v778_v32 }
  0x72   :  { %384 = vmatpush1.bf16.msra.mxu1 %v780_v33 }
  0x73   :  { %385 = vmatprep.subr.bf16.mxu1 %v781_v34 }
  0x76   :  { %386 = vmatpush1.bf16.msra.mxu1 %v783_v35 }
 0x10f   :  { %v140_v55 = vpop.f32.mrb[0].mxu0 }
 0x110   :  { %v141_v56 = vadd.f32 %v140_v55, %v85_v53  ;;  %v142_v57 = vpop.f32.mrb[1].mxu0 }
 0x111   :  { %v143_v58 = vadd.f32 %v142_v57, %v89_v54  ;;  %v144_v59 = vpop.f32.mrb[2].mxu0 }
 0x112   :  { %v147_v60 = vmax.f32 %v141_v56, 0.0  ;;  %v145_v61 = vpop.f32.mrb[3].mxu0 }
 0x113   :  { %v148_v62 = vmax.f32 %v143_v58, 0.0 }
 0x114   :  { %v149_v0 = vpack.c.bf16 %v147_v60, %v147_v60 }
 0x115   :  { %v150_v63 = vpack.c.bf16 %v148_v62, %v148_v62 }
 0x117   :  { %387 = vmatprep.mubr.bf16.mxu1 %v150_v63 }
 0x118   :  { %388 = vmatmul.mubr.bf16.vlgmr.msra.gmra.mrb[0].mxu1 %v149_v0 }
 0x1eb   :  { %v389_v8 = vpop.f32.mrb[0].mxu1 }
 0x1ec   :  { %v390_v9 = vadd.f32 %v389_v8, %v188_v6  ;;  %v391_v10 = vpop.f32.mrb[1].mxu1 }
 0x1ed   :  { %v392_v11 = vadd.f32 %v391_v10, %v192_v7  ;;  %v393_v12 = vpop.f32.mrb[2].mxu1 }
 0x1ee   :  { %v396_v13 = vmax.f32 %v390_v9, 0.0  ;;  %v394_v14 = vpop.f32.mrb[3].mxu1 }
 0x1ef   :  { %v397_v15 = vmax.f32 %v392_v11, 0.0 }
 0x1f0   :  { %v398_v17 = vpack.c.bf16 %v396_v13, %v396_v13 }
 0x1f1   :  { %v399_v16 = vpack.c.bf16 %v397_v15, %v397_v15 }
 0x1f3   :  { %567 = vmatprep.mubr.bf16.mxu0 %v399_v16 }
 0x1f4   :  { %568 = vmatmul.mubr.bf16.vlgmr.msra.gmra.mrb[4].mxu0 %v398_v17 }
 0x2c7   :  { %v718_v18 = vpop.f32.mrb[4].mxu0 }
 0x2c8   :  { %v719_v20 = vpop.f32.mrb[5].mxu0 }
 0x2c9   :  { %v720_v21 = vadd.f32 %v719_v20, %v718_v18  ;;  %v721_v22 = vpop.f32.mrb[6].mxu0 }
 0x2ca   :  { %v722_v23 = vpop.f32.mrb[7].mxu0 }
 0x2cb   :  { %v570_v24 = vadd.f32 %v720_v21, %v684_v19 }
 0x2cd   :  { %v575_v25 = vmax.f32 %v570_v24, -20.0 }
 0x2cf   :  { %v576_v26 = vmin.f32 %v575_v25, 2.0 }
 0x2d1   :  { %v577_v27 = vmul.f32 1.442695, %v576_v26  ;;  %v602_v56 = vsub.f32 0.0, %v576_v26 }
 0x2d3   :  { %800 = vpow2.f32 %v577_v27  ;;  %v701_v58 = vadd.f32 -0.9189385, %v602_v56 }
 0x2dd   :  { %v801_v30 = vpop.eup %800 }
 0x2de   :  { %581 = vrot.lane.b32.xlu0 %v801_v30, %s907_s3 }
 0x2e2   :  { %607 = vrot.lane.b32.xlu0 %v605_v31, %s907_s3 }
 0x350   :  { %v582_v32 = vpop.permute.xlu0 %581 }
 0x351   :  { %v584_v33 = vmul.f32 %v582_v32, %v579_v28 }
 0x353   :  { %v585_v34 = vadd.f32 %v584_v33, %v570_v24 }
 0x354   :  { %v608_v57 = vpop.permute.xlu0 %607 }
 0x355   :  { %v586_v35 = vand.u32 2147483647, %v585_v34  ;;  %802 = vtanh.f32 %v585_v34  ;;  %v590_v45 = vmul.f32 -2.0, %v585_v34  ;;  %v611_v53 = vsub.f32 0.6931472, %v585_v34 }
 0x356   :  { %v610_v59 = vsub.f32 %v701_v58, %v608_v57 }
 0x357   :  { %v587_v36 = vmul.f32 -2.0, %v586_v35  ;;  %v591_v50 = vmax.f32 %v590_v45, 0.0 }
 0x359   :  { %v588_v37 = vmul.f32 1.442695, %v587_v36 }
 0x35b   :  { %804 = vpow2.f32 %v588_v37 }
 0x35f   :  { %v803_v39 = vpop.eup %802 }
 0x360   :  { %v629_v40 = vmul.f32 %v803_v39, %v628_v38 }
 0x362   :  { %630 = vst.msk [vmem:[#allocation9] sm:$0x3] %vm623_vm1, %v629_v40 }
 0x365   :  { %v805_v41 = vpop.eup %804 }
 0x366   :  { %v592_v42 = vadd.f32 1.0, %v805_v41  ;;  %v595_v43 = vmul.f32 -0.5, %v805_v41  ;;  %v598_v46 = vand.u32 2147483647, %v805_v41 }
 0x368   :  { %806 = vlog2.f32 %v592_v42  ;;  %v596_v44 = vadd.f32 1.0, %v595_v43  ;;  %vm599_vm2 = vcmp.lt.f32.partialorder %v598_v46, 0.0004427343 }
 0x36a   :  { %v597_v49 = vmul.f32 %v805_v41, %v596_v44 }
 0x372   :  { %v807_v47 = vpop.eup %806 }
 0x373   :  { %v594_v48 = vmul.f32 0.6931472, %v807_v47 }
 0x375   :  { %v600_v51 = vsel %vm599_vm2, %v597_v49, %v594_v48 }
 0x376   :  { %v601_v52 = vadd.f32 %v600_v51, %v591_v50 }
 0x378   :  { %v612_v54 = vsub.f32 %v611_v53, %v601_v52 }
 0x37a   :  { %v613_v55 = vmul.f32 2.0, %v612_v54 }
 0x37c   :  { %615 = vrot.lane.b32.xlu1 %v613_v55, %s907_s3 }
 0x3ee   :  { %v616_v60 = vpop.permute.xlu1 %615 }
 0x3ef   :  { %v618_v61 = vsub.f32 %v610_v59, %v616_v60 }
 0x3f1   :  { %620 = vrot.lane.b32.xlu1 %v618_v61, %s907_s3 }
 0x463   :  { %v621_v62 = vpop.permute.xlu1 %620 }
 0x464   :  { %v624_v63 = vsel %vm623_vm1, %v621_v62, 0.0 }
 0x465   :  { %625 = vadd.xlane.f32.xlu0 %v624_v63 }
 0x4f2   :  { %v626_v0 = vpop.xlane.xlu0 %625 }
 0x4f3   :  { %632 = vst.msk [vmem:[#allocation9] sm:$0x3] %vm631_vm3, %v626_v0 }
 0x4f4   :  { %885 = shalt.err (!%p882_p0)
}
 0x4f5   :  { %s886_s15 = scalar_lea.hbm %s1051_s9, 32 }
 0x4f6   :  { %p887_p1 = scmp.ne.s32.totalorder %s1051_s9, %s886_s15  ;;  %p890_p2 = scmp.lt.u32.totalorder %s886_s15, %s1051_s9 }
 0x4f8   :  { %p892_p3 = pnand %p890_p2, %p887_p1 }
 0x4fa   :  { %895 = shalt.err (!%p892_p3)
}
 0x4fb   :  { %642 = dma.vmem_to_hbm [thread:$0]  %s640_s2, 32, %s1051_s9, [#allocation5]  }
 0x4fc   :  { %900 = dma.done.wait [#allocation5], 32  }
 0x4fd   :  { %901 = vsyncadd [#allocation5], 4294967264 }
 0x4fe   :  { %646 = vsyncpa [#allocation4], 1 }
 0x4ff   :  { %647 = vsyncpa [#allocation7], 1 }
 0x500   :  { %648 = vsyncpa [#allocation5], 1 }

</bundles_post_ra>
